<compile_context>
chip_gen: v7x
topology: tpu7x:2x2x1
jax: 0.10.0
libtpu: 0.0.40
codegen_flags: <defaults>
</compile_context>

<pallas_src>
import jax
import jax.numpy as jnp
from jax.experimental import pallas as pl
from jax.experimental.pallas import tpu as pltpu


def _round_up(x, m):
    return ((x + m - 1) // m) * m


def multi_loss(preds, target, smooth=1e-6, block_rows=None):
    """preds: (B, C, D, H, W) probabilities in (0,1); target: (B, 1, D, H, W)."""
    B, C, D, H, W = preds.shape
    assert target.shape == (B, 1, D, H, W), target.shape
    S = D * H * W

    p = preds.reshape(B, C, S)
    t = target.reshape(B, 1, S)

    # ---- lane packing: view the spatial axis as (R rows, 128 lanes) --------
    if S % 128 == 0:
        S_pack = S                              # zero-copy reshape
    else:
        # TODO(synk): this branch pads (one HBM copy of the volume); common
        # 3-D shapes have S % 128 == 0 and take the zero-copy path above.
        S_pack = _round_up(S, 1024)             # multiple of 8*128 -> aligned rows
        p = jnp.pad(p, ((0, 0), (0, 0), (0, S_pack - S)))
        t = jnp.pad(t, ((0, 0), (0, 0), (0, S_pack - S)))
    R = S_pack // 128
    p = p.reshape(B, C, R, 128)
    t = t.reshape(B, 1, R, 128)

    # ---- row-block size -----------------------------------------------------
    itemsize = jnp.dtype(preds.dtype).itemsize
    row_align = 16 if itemsize == 2 else 8
    if block_rows is None:
        # ~6 MiB of (preds + target) per step -> double-buffered pipeline fits
        # the default scoped-VMEM limit on every generation (v5e..v7x).
        budget = 6 << 20
        block_rows = budget // (128 * itemsize * (C + 1))
    block_rows = min(int(block_rows), R)
    if R >= row_align:
        block_rows = max(row_align, (block_rows // row_align) * row_align)
    else:
        block_rows = R                          # tiny volume: full-extent rows
    TR = block_rows

    n_blocks = pl.cdiv(R, TR)
    n_half = pl.cdiv(n_blocks, 2)               # per-TensorCore share (v7x)
    shift = n_blocks - n_half                   # core-1 start block (in bounds)
    needs_lo = (n_blocks % 2) == 1              # odd -> the two halves overlap
    needs_hi = (R % TR) != 0                    # ragged last block

    def kernel(p_ref, t_ref, out_ref, acc_ref):
        s = pl.program_id(2)

        @pl.when(s == 0)
        def _():
            acc_ref[...] = jnp.zeros_like(acc_ref)

        pv = p_ref[0].astype(jnp.float32)       # (C, TR, 128)
        tv = t_ref[0, 0].astype(jnp.float32)    # (TR, 128)

        # Row mask: kills (a) block padding past R and (b) rows owned by the
        # other core when the two halves overlap.  Applied to p AND t before
        # any log/multiply so OOB garbage can never become NaN.
        if needs_lo or needs_hi:
            core = pl.program_id(0)
            row0 = (core * shift + s) * TR
            rid = jax.lax.broadcasted_iota(jnp.int32, (TR, 128), 0) + row0
            valid = None
            if needs_hi:
                valid = rid < R
            if needs_lo:
                lo_ok = rid >= core * (n_half * TR)
                valid = lo_ok if valid is None else (valid & lo_ok)
            tv = jnp.where(valid, tv, 0.0)
            pv = jnp.where(valid, pv, 0.0)      # (TR,128) mask broadcasts over C

        # BCE with PyTorch's -100 clamp, 1-mul form (clamp before the multiply
        # so t * log(p) can never be 0 * -inf).
        log_p = jnp.maximum(jnp.log(pv), -100.0)
        log_1mp = jnp.maximum(jnp.log(1.0 - pv), -100.0)
        bce = -(log_1mp + tv * (log_p - log_1mp))           # (C, TR, 128)

        # Per-channel lane partials (sublane reduce only); the cross-lane
        # reduce + narrow (4, C) store happen once, at the last spatial step.
        acc_ref[0, :, :] += jnp.sum(bce, axis=1)            # (C, 128) BCE
        acc_ref[1, :, :] += jnp.sum(pv * tv, axis=1)        # (C, 128) intersection
        acc_ref[2, :, :] += jnp.sum(pv, axis=1)             # (C, 128) pred sum
        acc_ref[3, :, :] += jnp.sum(tv, axis=0)             # (128,) tgt sum, bcast

        @pl.when(s == n_half - 1)
        def _():
            out_ref[0, 0] = jnp.sum(acc_ref[...], axis=-1)  # (4, C)

    cost = pl.CostEstimate(
        flops=int(12 * B * C * S_pack),
        transcendentals=int(2 * B * C * S_pack),
        bytes_accessed=int(p.size * itemsize
                           + t.size * jnp.dtype(target.dtype).itemsize
                           + 2 * B * 4 * C * 4),
    )

    out = pl.pallas_call(
        kernel,
        out_shape=jax.ShapeDtypeStruct((2, B, 4, C), jnp.float32),
        grid_spec=pltpu.PrefetchScalarGridSpec(
            num_scalar_prefetch=0,
            grid=(2, B, n_half),
            in_specs=[
                pl.BlockSpec((1, C, TR, 128),
                             lambda c, b, s: (b, 0, c * shift + s, 0)),
                pl.BlockSpec((1, 1, TR, 128),
                             lambda c, b, s: (b, 0, c * shift + s, 0)),
            ],
            out_specs=pl.BlockSpec((1, 1, 4, C), lambda c, b, s: (c, b, 0, 0)),
            scratch_shapes=[pltpu.VMEM((4, C, 128), jnp.float32)],
        ),
        compiler_params=pltpu.CompilerParams(
            dimension_semantics=("parallel", "parallel", "arbitrary"),
            vmem_limit_bytes=32 * 1024 * 1024,
        ),
        cost_estimate=cost,
    )(p, t)

    out = out.sum(axis=0)        # combine the two per-core halves -> (B, 4, C)
    bce_sum = out[:, 0, :]       # (B, C)
    inter = out[:, 1, :]         # (B, C)
    psum = out[:, 2, :]          # (B, C)
    tsum = out[:, 3, :]          # (B, C)  sum(target) replicated across channels

    # ChannelWiseBCELoss: mean over spatial, channels, batch == global mean.
    bce_loss = jnp.sum(bce_sum) / (B * C * S)
    # DiceLoss
    dice_score = (2.0 * inter + smooth) / (psum + tsum + smooth)
    dice_loss = jnp.mean(1.0 - dice_score)
    return bce_loss + dice_loss


def multi_loss_ref(preds, target, smooth=1e-6):
    """Pure-JAX reference mirroring the PyTorch MultiLoss module."""
    t = jnp.broadcast_to(target, preds.shape)
    log_p = jnp.maximum(jnp.log(preds), -100.0)
    log_1mp = jnp.maximum(jnp.log(1.0 - preds), -100.0)
    bce = -(t * log_p + (1.0 - t) * log_1mp)
    bce_loss = bce.mean(axis=(2, 3, 4)).mean(axis=1).mean()
    inter = jnp.sum(preds * t, axis=(2, 3, 4))
    psum = jnp.sum(preds, axis=(2, 3, 4))
    tsum = jnp.sum(t, axis=(2, 3, 4))
    dice = (2.0 * inter + smooth) / (psum + tsum + smooth)
    dice_loss = (1.0 - dice).mean(axis=1).mean()
    return bce_loss + dice_loss


if __name__ == "__main__":
    key = jax.random.PRNGKey(0)
    k1, k2, k3, k4 = jax.random.split(key, 4)

    # --- case 1: zero-copy packed layout (S % 128 == 0), single row block ---
    B, C, D, H, W = 2, 4, 4, 8, 32               # S = 1024 -> R = 8 lane-rows
    preds = jax.nn.sigmoid(jax.random.normal(k1, (B, C, D, H, W), jnp.float32))
    target = jax.random.uniform(k2, (B, 1, D, H, W), jnp.float32)
    ref = multi_loss_ref(preds, target)
    out = jax.block_until_ready(multi_loss(preds, target))
    assert jnp.allclose(out, ref, rtol=1e-5, atol=1e-5), (out, ref)

    # --- case 2: multi row-block, ragged tail + megacore-overlap masking ----
    B, C, D, H, W = 2, 4, 8, 8, 80               # S = 5120 -> R = 40 lane-rows
    preds2 = jax.nn.sigmoid(jax.random.normal(k3, (B, C, D, H, W), jnp.float32))
    target2 = jax.random.uniform(k4, (B, 1, D, H, W), jnp.float32)
    ref2 = multi_loss_ref(preds2, target2)
    out2 = jax.block_until_ready(multi_loss(preds2, target2, block_rows=16))
    assert jnp.allclose(out2, ref2, rtol=1e-5, atol=1e-5), (out2, ref2)

    # --- case 3: S % 128 != 0 -> padded path, odd channel count -------------
    B, C, D, H, W = 2, 3, 4, 8, 10               # S = 320 -> padded to 1024
    preds3 = jax.nn.sigmoid(jax.random.normal(k1, (B, C, D, H, W), jnp.float32))
    target3 = jax.random.uniform(k2, (B, 1, D, H, W), jnp.float32)
    ref3 = multi_loss_ref(preds3, target3)
    out3 = jax.block_until_ready(multi_loss(preds3, target3))
    assert jnp.allclose(out3, ref3, rtol=1e-5, atol=1e-5), (out3, ref3)

    # --- case 4: bf16 inputs streamed natively, f32 accumulation ------------
    p_bf = preds2.astype(jnp.bfloat16)
    t_bf = target2.astype(jnp.bfloat16)
    ref_bf = multi_loss_ref(p_bf.astype(jnp.float32), t_bf.astype(jnp.float32))
    out_bf = jax.block_until_ready(multi_loss(p_bf, t_bf, block_rows=16))
    assert jnp.allclose(out_bf, ref_bf, rtol=2e-2, atol=2e-2), (out_bf, ref_bf)

    print("KERNEL_OK")
</pallas_src>

<mosaic_0001>
module attributes {stable_mosaic.version = 11 : i64} {
  func.func @kernel(%arg0: i32, %arg1: i32, %arg2: i32, %arg3: memref<1x4x8x128xf32, #tpu.memory_space<vmem>>, %arg4: memref<1x1x8x128xf32, #tpu.memory_space<vmem>>, %arg5: memref<1x1x4x4xf32, #tpu.memory_space<vmem>>, %arg6: memref<4x4x128xf32, #tpu.memory_space<vmem>>) attributes {dimension_semantics = [#tpu.dimension_semantics<parallel>, #tpu.dimension_semantics<parallel>, #tpu.dimension_semantics<arbitrary>], iteration_bounds = array<i64: 2, 2, 1>, scalar_prefetch = 0 : i64, scratch_operands = 1 : i64, tpu.core_type = #tpu.core_type<tc>, window_params = [{transform_indices = @transform_0, window_bounds = array<i64: 1, 4, 8, 128>}, {transform_indices = @transform_1, window_bounds = array<i64: 1, 1, 8, 128>}, {transform_indices = @transform_2, window_bounds = array<i64: 1, 1, 4, 4>}]} {
    %c0_i32 = arith.constant 0 : i32
    %0 = arith.cmpi eq, %arg2, %c0_i32 : i32
    %1 = arith.extui %0 : i1 to i32
    %c0_i32_0 = arith.constant 0 : i32
    %2 = arith.cmpi ne, %1, %c0_i32_0 : i32
    scf.if %2 {
      %cst_42 = arith.constant 0.000000e+00 : f32
      %73 = vector.broadcast %cst_42 : f32 to vector<4x4x128xf32>
      %c0_43 = arith.constant 0 : index
      %c0_44 = arith.constant 0 : index
      %c0_45 = arith.constant 0 : index
      %74 = vector.load %arg6[%c0_43, %c0_44, %c0_45] : memref<4x4x128xf32, #tpu.memory_space<vmem>>, vector<4x4x128xf32>
      tpu.vector_store %arg6[%c0_43, %c0_44, %c0_45], %73 {strides = array<i32>} : memref<4x4x128xf32, #tpu.memory_space<vmem>>, vector<4x4x128xf32>,
    } else {
    }
    %c0 = arith.constant 0 : index
    %c0_1 = arith.constant 0 : index
    %c0_2 = arith.constant 0 : index
    %c0_3 = arith.constant 0 : index
    %3 = vector.load %arg3[%c0, %c0_1, %c0_2, %c0_3] : memref<1x4x8x128xf32, #tpu.memory_space<vmem>>, vector<1x4x8x128xf32>
    %4 = vector.shape_cast %3 : vector<1x4x8x128xf32> to vector<4x8x128xf32>
    %c0_4 = arith.constant 0 : index
    %c0_5 = arith.constant 0 : index
    %c0_6 = arith.constant 0 : index
    %c0_7 = arith.constant 0 : index
    %5 = vector.load %arg4[%c0_4, %c0_5, %c0_6, %c0_7] : memref<1x1x8x128xf32, #tpu.memory_space<vmem>>, vector<1x1x8x128xf32>
    %6 = vector.shape_cast %5 : vector<1x1x8x128xf32> to vector<8x128xf32>
    %c0_i32_8 = arith.constant 0 : i32
    %7 = arith.muli %arg0, %c0_i32_8 : i32
    %8 = arith.addi %7, %arg2 : i32
    %c8_i32 = arith.constant 8 : i32
    %9 = arith.muli %8, %c8_i32 : i32
    %10 = tpu.iota {dimensions = array<i32: 0>} : vector<8x128xi32>
    %11 = vector.broadcast %9 : i32 to vector<8x128xi32>
    %12 = arith.addi %10, %11 : vector<8x128xi32>
    %c8_i32_9 = arith.constant 8 : i32
    %13 = arith.muli %arg0, %c8_i32_9 : i32
    %14 = vector.broadcast %13 : i32 to vector<8x128xi32>
    %15 = arith.cmpi sge, %12, %14 : vector<8x128xi32>
    %cst = arith.constant 0.000000e+00 : f32
    %16 = vector.broadcast %cst : f32 to vector<8x128xf32>
    %17 = arith.select %15, %6, %16 : vector<8x128xi1>, vector<8x128xf32>
    %cst_10 = arith.constant 0.000000e+00 : f32
    %18 = vector.shape_cast %15 : vector<8x128xi1> to vector<1x8x128xi1>
    %19 = vector.broadcast %18 : vector<1x8x128xi1> to vector<4x8x128xi1>
    %20 = vector.broadcast %cst_10 : f32 to vector<4x8x128xf32>
    %21 = arith.select %19, %4, %20 : vector<4x8x128xi1>, vector<4x8x128xf32>
    %22 = math.log %21 : vector<4x8x128xf32>
    %cst_11 = arith.constant -1.000000e+02 : f32
    %23 = vector.broadcast %cst_11 : f32 to vector<4x8x128xf32>
    %24 = arith.maximumf %22, %23 : vector<4x8x128xf32>
    %cst_12 = arith.constant 1.000000e+00 : f32
    %25 = vector.broadcast %cst_12 : f32 to vector<4x8x128xf32>
    %26 = arith.subf %25, %21 : vector<4x8x128xf32>
    %27 = math.log %26 : vector<4x8x128xf32>
    %cst_13 = arith.constant -1.000000e+02 : f32
    %28 = vector.broadcast %cst_13 : f32 to vector<4x8x128xf32>
    %29 = arith.maximumf %27, %28 : vector<4x8x128xf32>
    %30 = arith.subf %24, %29 : vector<4x8x128xf32>
    %31 = vector.shape_cast %17 : vector<8x128xf32> to vector<1x8x128xf32>
    %32 = vector.broadcast %31 : vector<1x8x128xf32> to vector<4x8x128xf32>
    %33 = arith.mulf %32, %30 : vector<4x8x128xf32>
    %34 = arith.addf %29, %33 : vector<4x8x128xf32>
    %cst_14 = arith.constant 0.000000e+00 : f32
    %35 = vector.broadcast %cst_14 : f32 to vector<4x8x128xf32>
    %36 = arith.subf %35, %34 : vector<4x8x128xf32>
    %c0_15 = arith.constant 0 : index
    %c0_16 = arith.constant 0 : index
    %c0_17 = arith.constant 0 : index
    %37 = vector.load %arg6[%c0_15, %c0_16, %c0_17] : memref<4x4x128xf32, #tpu.memory_space<vmem>>, vector<1x4x128xf32>
    %38 = vector.shape_cast %37 : vector<1x4x128xf32> to vector<4x128xf32>
    %cst_18 = arith.constant dense<0.000000e+00> : vector<4x128xf32>
    %39 = vector.multi_reduction <add>, %36, %cst_18 [1] : vector<4x8x128xf32> to vector<4x128xf32>
    %40 = arith.addf %38, %39 : vector<4x128xf32>
    %c0_19 = arith.constant 0 : index
    %c0_20 = arith.constant 0 : index
    %c0_21 = arith.constant 0 : index
    %41 = vector.load %arg6[%c0_19, %c0_20, %c0_21] : memref<4x4x128xf32, #tpu.memory_space<vmem>>, vector<1x4x128xf32>
    %42 = vector.shape_cast %41 : vector<1x4x128xf32> to vector<4x128xf32>
    %43 = vector.shape_cast %40 : vector<4x128xf32> to vector<1x4x128xf32>
    tpu.vector_store %arg6[%c0_19, %c0_20, %c0_21], %43 {strides = array<i32>} : memref<4x4x128xf32, #tpu.memory_space<vmem>>, vector<1x4x128xf32>,
    %c1 = arith.constant 1 : index
    %c0_22 = arith.constant 0 : index
    %c0_23 = arith.constant 0 : index
    %44 = vector.load %arg6[%c1, %c0_22, %c0_23] : memref<4x4x128xf32, #tpu.memory_space<vmem>>, vector<1x4x128xf32>
    %45 = vector.shape_cast %44 : vector<1x4x128xf32> to vector<4x128xf32>
    %46 = vector.shape_cast %17 : vector<8x128xf32> to vector<1x8x128xf32>
    %47 = vector.broadcast %46 : vector<1x8x128xf32> to vector<4x8x128xf32>
    %48 = arith.mulf %21, %47 : vector<4x8x128xf32>
    %cst_24 = arith.constant dense<0.000000e+00> : vector<4x128xf32>
    %49 = vector.multi_reduction <add>, %48, %cst_24 [1] : vector<4x8x128xf32> to vector<4x128xf32>
    %50 = arith.addf %45, %49 : vector<4x128xf32>
    %c1_25 = arith.constant 1 : index
    %c0_26 = arith.constant 0 : index
    %c0_27 = arith.constant 0 : index
    %51 = vector.load %arg6[%c1_25, %c0_26, %c0_27] : memref<4x4x128xf32, #tpu.memory_space<vmem>>, vector<1x4x128xf32>
    %52 = vector.shape_cast %51 : vector<1x4x128xf32> to vector<4x128xf32>
    %53 = vector.shape_cast %50 : vector<4x128xf32> to vector<1x4x128xf32>
    tpu.vector_store %arg6[%c1_25, %c0_26, %c0_27], %53 {strides = array<i32>} : memref<4x4x128xf32, #tpu.memory_space<vmem>>, vector<1x4x128xf32>,
    %c2 = arith.constant 2 : index
    %c0_28 = arith.constant 0 : index
    %c0_29 = arith.constant 0 : index
    %54 = vector.load %arg6[%c2, %c0_28, %c0_29] : memref<4x4x128xf32, #tpu.memory_space<vmem>>, vector<1x4x128xf32>
    %55 = vector.shape_cast %54 : vector<1x4x128xf32> to vector<4x128xf32>
    %cst_30 = arith.constant dense<0.000000e+00> : vector<4x128xf32>
    %56 = vector.multi_reduction <add>, %21, %cst_30 [1] : vector<4x8x128xf32> to vector<4x128xf32>
    %57 = arith.addf %55, %56 : vector<4x128xf32>
    %c2_31 = arith.constant 2 : index
    %c0_32 = arith.constant 0 : index
    %c0_33 = arith.constant 0 : index
    %58 = vector.load %arg6[%c2_31, %c0_32, %c0_33] : memref<4x4x128xf32, #tpu.memory_space<vmem>>, vector<1x4x128xf32>
    %59 = vector.shape_cast %58 : vector<1x4x128xf32> to vector<4x128xf32>
    %60 = vector.shape_cast %57 : vector<4x128xf32> to vector<1x4x128xf32>
    tpu.vector_store %arg6[%c2_31, %c0_32, %c0_33], %60 {strides = array<i32>} : memref<4x4x128xf32, #tpu.memory_space<vmem>>, vector<1x4x128xf32>,
    %c3 = arith.constant 3 : index
    %c0_34 = arith.constant 0 : index
    %c0_35 = arith.constant 0 : index
    %61 = vector.load %arg6[%c3, %c0_34, %c0_35] : memref<4x4x128xf32, #tpu.memory_space<vmem>>, vector<1x4x128xf32>
    %62 = vector.shape_cast %61 : vector<1x4x128xf32> to vector<4x128xf32>
    %cst_36 = arith.constant dense<0.000000e+00> : vector<128xf32>
    %63 = vector.multi_reduction <add>, %17, %cst_36 [0] : vector<8x128xf32> to vector<128xf32>
    %64 = vector.shape_cast %63 : vector<128xf32> to vector<1x128xf32>
    %65 = vector.broadcast %64 : vector<1x128xf32> to vector<4x128xf32>
    %66 = arith.addf %62, %65 : vector<4x128xf32>
    %c3_37 = arith.constant 3 : index
    %c0_38 = arith.constant 0 : index
    %c0_39 = arith.constant 0 : index
    %67 = vector.load %arg6[%c3_37, %c0_38, %c0_39] : memref<4x4x128xf32, #tpu.memory_space<vmem>>, vector<1x4x128xf32>
    %68 = vector.shape_cast %67 : vector<1x4x128xf32> to vector<4x128xf32>
    %69 = vector.shape_cast %66 : vector<4x128xf32> to vector<1x4x128xf32>
    tpu.vector_store %arg6[%c3_37, %c0_38, %c0_39], %69 {strides = array<i32>} : memref<4x4x128xf32, #tpu.memory_space<vmem>>, vector<1x4x128xf32>,
    %c0_i32_40 = arith.constant 0 : i32
    %70 = arith.cmpi eq, %arg2, %c0_i32_40 : i32
    %71 = arith.extui %70 : i1 to i32
    %c0_i32_41 = arith.constant 0 : i32
    %72 = arith.cmpi ne, %71, %c0_i32_41 : i32
    scf.if %72 {
      %c0_42 = arith.constant 0 : index
      %c0_43 = arith.constant 0 : index
      %c0_44 = arith.constant 0 : index
      %73 = vector.load %arg6[%c0_42, %c0_43, %c0_44] : memref<4x4x128xf32, #tpu.memory_space<vmem>>, vector<4x4x128xf32>
      %cst_45 = arith.constant dense<0.000000e+00> : vector<4x4xf32>
      %74 = vector.multi_reduction <add>, %73, %cst_45 [2] : vector<4x4x128xf32> to vector<4x4xf32>
      %c0_46 = arith.constant 0 : index
      %c0_47 = arith.constant 0 : index
      %c0_48 = arith.constant 0 : index
      %c0_49 = arith.constant 0 : index
      %75 = vector.load %arg5[%c0_46, %c0_47, %c0_48, %c0_49] : memref<1x1x4x4xf32, #tpu.memory_space<vmem>>, vector<1x1x4x4xf32>
      %76 = vector.shape_cast %75 : vector<1x1x4x4xf32> to vector<4x4xf32>
      %77 = vector.shape_cast %74 : vector<4x4xf32> to vector<1x1x4x4xf32>
      tpu.vector_store %arg5[%c0_46, %c0_47, %c0_48, %c0_49], %77 {strides = array<i32>} : memref<1x1x4x4xf32, #tpu.memory_space<vmem>>, vector<1x1x4x4xf32>,
    } else {
    }
    return
  }
  func.func @transform_0(%arg0: i32, %arg1: i32, %arg2: i32) -> (i32, i32, i32, i32) {
    %c0_i32 = arith.constant 0 : i32
    %0 = arith.muli %arg0, %c0_i32 : i32
    %1 = arith.addi %0, %arg2 : i32
    %c0_i32_0 = arith.constant 0 : i32
    %c0_i32_1 = arith.constant 0 : i32
    %c0_i32_2 = arith.constant 0 : i32
    return %arg1, %c0_i32_0, %1, %c0_i32_1 : i32, i32, i32, i32
  }
  func.func @transform_1(%arg0: i32, %arg1: i32, %arg2: i32) -> (i32, i32, i32, i32) {
    %c0_i32 = arith.constant 0 : i32
    %0 = arith.muli %arg0, %c0_i32 : i32
    %1 = arith.addi %0, %arg2 : i32
    %c0_i32_0 = arith.constant 0 : i32
    %c0_i32_1 = arith.constant 0 : i32
    %c0_i32_2 = arith.constant 0 : i32
    return %arg1, %c0_i32_0, %1, %c0_i32_1 : i32, i32, i32, i32
  }
  func.func @transform_2(%arg0: i32, %arg1: i32, %arg2: i32) -> (i32, i32, i32, i32) {
    %c0_i32 = arith.constant 0 : i32
    %c0_i32_0 = arith.constant 0 : i32
    %c0_i32_1 = arith.constant 0 : i32
    return %arg0, %arg1, %c0_i32, %c0_i32_0 : i32, i32, i32, i32
  }
}

</mosaic_0001>

<bundles_post_ra>
// kernel: tpu_custom_call.1
= control target key start
LH: loop header
LB: loop body
LE: loop exit
PB: predicated region body
PF: predicated region fallthrough
CT: control target
= control target key end

     0   :  { %s1251_s0 = inlined_call_operand.hbm [shape: f32[2,4,8,128], index: 0, kind: input, shape index: {}]   ;;  %s1252_s1 = inlined_call_operand.hbm [shape: f32[2,1,8,128], index: 1, kind: input, shape index: {}]   ;;  %s1253_s2 = inlined_call_operand.hbm [shape: f32[2,2,4,4], index: 2, kind: output, shape index: {}]  }
   0x1   :  { %1259 = sst [smem:[#allocation15_spill]] %s1251_s0 }
   0x2   :  { %7 = vsyncpa [#allocation4], 0 }
   0x3   :  { %9 = vsyncpa [#allocation4 + $0x1], 0 }
   0x4   :  { %10 = vsyncpa [#allocation7], 0 }
   0x5   :  { %12 = vsyncpa [#allocation7 + $0x1], 0 }
   0x6   :  { %13 = vsyncpa [#allocation5], 0 }
   0x7   :  { %15 = vsyncpa [#allocation5 + $0x1], 0  ;;  %s953_s9 = smov 0   ;;  %s955_s10 = smov 0  }
   0x8   :  { %s957_s11 = smov 0   ;;  %s959_s12 = smov 0  }
   0x9   :  { %s961_s13 = smov 0   ;;  %s963_s14 = smov 0  }
   0xa   :  { %s965_s15 = smov 0   ;;  %s967_s16 = smov 0  }
   0xb   :  { %s969_s17 = smov 0   ;;  %s971_s18 = smov 0  }
   0xc   :  { %s973_s19 = smov 0  }
   0xd LB: > { %1260 = sst [smem:[#allocation12_spill]] %s926_s18  ;;  %s598_s20 = sadd.s32 4294967295, %s930_s19   ;;  %s930_s19 = sphi %s973_s19, %s21_s19   ;;  %s926_s18 = sphi %s971_s18, %s1278_s18   ;;  %s922_s17 = sphi %s969_s17, %s1286_s17   ;;  %s918_s16 = sphi %s967_s16, %s1276_s16   ;;  %s914_s15 = sphi %s965_s15, %s1285_s15   ;;  %s910_s14 = sphi %s963_s14, %s1284_s14   ;;  %s906_s13 = sphi %s961_s13, %s1283_s13   ;;  %s902_s12 = sphi %s959_s12, %s1282_s12   ;;  %s898_s11 = sphi %s957_s11, %s1281_s11   ;;  %s894_s10 = sphi %s955_s10, %s1280_s10   ;;  %s890_s9 = sphi %s953_s9, %s1279_s9  }
   0xe   : > { %s599_s21 = sadd.s32 4294967294, %s930_s19   ;;  %s36_s22 = sadd.s32 1, %s922_s17 }
   0xf   : > { %s40_s23 = sadd.s32 1, %s926_s18  ;;  %p38_p0 = scmp.ge.s32.totalorder %s36_s22, 2 }
  0x10   : > { %s49_s24 = sadd.s32 1, %s910_s14  ;;  %p56_p1 = scmp.ne.s32.totalorder %s910_s14, %s906_s13 }
  0x11   : > { %p57_p2 = scmp.eq.s32.totalorder %s930_s19, 0  ;;  %s1288_s22 = smov (%p38_p0, %s36_s22), 0 }
  0x12   : > { %1261 = sst [smem:[#allocation13_spill]] %s1288_s22  ;;  %s1290_s23 = smov (!%p38_p0, %s40_s23), %s926_s18 }
  0x13   : > { %s44_s25 = ssub.s32 %s922_s17, %s1288_s22  ;;  %p1019_p3 = por %p57_p2, %p56_p1 }
  0x14   : > { %p42_p4 = scmp.ge.s32.totalorder %s1290_s23, 2  ;;  %p47_p5 = scmp.eq.s32.totalorder %s44_s25, 0 }
  0x15   : > { %p62_p6 = scmp.ne.s32.totalorder %s906_s13, %s902_s12  ;;  %p63_p7 = scmp.eq.s32.totalorder %s598_s20, 0 }
  0x16   : > { %s1292_s23 = smov (%p42_p4, %s1290_s23), 0  ;;  %s105_s3 = sadd.s32 1, %s898_s11 }
  0x17   : > { %1263 = sst [smem:[#allocation14_spill]] %s1292_s23  ;;  %p1029_p8 = por %p63_p7, %p62_p6 }
  0x18   : > { %s1027_s27 = scalar_select %p47_p5, %s910_s14, %s49_s24  }
  0x19   : > { %s1264_s28 = scalar_select %p1029_p8, 1, 0 }
  0x1a   : > { %s100_s29 = ssub.s32 %s926_s18, %s1292_s23  ;;  %p115_p10 = scmp.ne.s32.totalorder %s898_s11, %s894_s10 }
  0x1b   : > { %s102_s30 = sor.u32 %s100_s29, %s44_s25  ;;  %p116_p11 = scmp.eq.s32.totalorder %s598_s20, 3 }
  0x1c   : > { %p103_p9 = scmp.eq.s32.totalorder %s102_s30, 0  ;;  %p121_p12 = scmp.ne.s32.totalorder %s894_s10, %s890_s9 }
  0x1d   : > { %p1043_p13 = por %p116_p11, %p115_p10  ;;  %p122_p0 = scmp.eq.s32.totalorder %s599_s21, 3 }
  0x1e   : > { %s1041_s4 = scalar_select %p103_p9, %s898_s11, %s105_s3  }
  0x1f   : > { %s1265_s5 = scalar_select %p1043_p13, 1, 0 }
  0x20   : > { %p635_p1 = scmp.lt.s32.totalorder %s930_s19, 4  ;;  %p1048_p2 = por %p122_p0, %p121_p12 }
  0x21   : > { %s1053_s7 = sand.u32 1, %s910_s14   ;;  %s617_s12 = sshll.u32 %s922_s17, 9 }
  0x22   : > { %s1266_s6 = scalar_select %p1048_p2, 1, 0 }
  0x23   : > { %s602_s8 = sshll.u32 %s1053_s7, 5  ;;  %s1267_s0 = sld [smem:[#allocation15_spill]] }
  0x24   : > { %s146_s21 = scalar_lea.vmem [#allocation3], %s602_s8  ;;  %p1066_p4 = pnand %p635_p1, %p1019_p3 }
  0x25   : > { %s154_s29 = sshll.u32 %s146_s21, 4  ;;  %s1062_s29 = int_to_ptr.vmem [resolvable:$true] %s154_s29 }
  0x26   : > { %p746_p7 = pneg %p1066_p4 }
  0x29   : > { %s1060_s25 = scalar_lea.hbm %s1267_s0, %s617_s12  ;;  %s749_s26 = scalar_lea.hbm %s1267_s0, 1024 }
  0x2a   : > { %s744_s20 = scalar_lea.hbm %s1060_s25, 512  ;;  %p750_p3 = scmp.lt.u32.totalorder %s1060_s25, %s1267_s0 }
  0x2b   : > { %p745_p6 = scmp.ne.s32.totalorder %s1060_s25, %s744_s20  ;;  %p751_p11 = scmp.lt.u32.totalorder %s749_s26, %s744_s20 }
  0x2c   : > { %p753_p0 = scmp.lt.u32.totalorder %s744_s20, %s1060_s25 }
  0x2d   : > { %p747_p9 = pnand %p746_p7, %p745_p6  ;;  %p752_p12 = por %p751_p11, %p750_p3 }
  0x2f   : > { %p748_p10 = pneg %p747_p9  ;;  %p754_p1 = por %p753_p0, %p752_p12 }
  0x31   : > { %p755_p5 = pnand %p754_p1, %p748_p10 }
  0x33   : > { %758 = shalt.err (!%p755_p5)
}
  0x34   : > { %s759_s3 = scalar_lea.vmem %s1062_s29, 512  ;;  %s932_s8 = smov [#allocation3]  }
  0x35   : > { %p760_p6 = scmp.ne.s32.totalorder %s1062_s29, %s759_s3  ;;  %s764_s12 = sshll.u32 %s932_s8, 4  ;;  %s765_s12 = int_to_ptr.vmem [resolvable:$false] %s764_s12 }
  0x36   : > { %s766_s24 = scalar_lea.vmem %s765_s12, 1024  ;;  %p767_p13 = scmp.lt.s32.totalorder %s1062_s29, %s765_s12 }
  0x37   : > { %p762_p9 = pnand %p760_p6, %p746_p7  ;;  %p768_p3 = scmp.lt.s32.totalorder %s766_s24, %s759_s3 }
  0x39   : > { %p763_p2 = pneg %p762_p9  ;;  %p769_p11 = por %p768_p3, %p767_p13 }
  0x3b   : > { %p770_p12 = pnand %p769_p11, %p763_p2 }
  0x3d   : > { %773 = shalt.err (!%p770_p12)
}
  0x3e   : > { %s933_s20 = smov 128   ;;  %s934_s26 = smov 8  }
  0x3f   : > { %s1269_s21 = scalar_lea.sflag [#allocation4], %s1053_s7  ;;  %p181_p5 = scmp.lt.s32.totalorder %s930_s19, 5 }
  0x40   : > { %627 = dma.hbm_to_vmem [thread:$0]  (!%p1066_p4), %s1060_s25, 512, %s1062_s29, %s1269_s21, %s933_s20, %s933_s20, %s934_s26  }
  0x41   : > { %s605_s3 = sshll.u32 %s1053_s7, 3  ;;  %s606_s8 = sshll.u32 %s922_s17, 7 }
  0x42   : > { %p1270_p13 = scmp.ge.s32.totalorder %s930_s19, 1  ;;  %s1111_s23 = scalar_lea.hbm %s1252_s1, %s606_s8 }
  0x43   : > { %s168_s22 = scalar_lea.vmem [#allocation6], %s605_s3  ;;  %s165_s25 = scalar_lea.sflag [#allocation7], %s1053_s7 }
  0x44   : > { %p1104_p2 = pnand %p1270_p13, %p181_p5  ;;  %s176_s18 = sshll.u32 %s168_s22, 4  ;;  %s177_s18 = int_to_ptr.vmem [resolvable:$true] %s176_s18 }
  0x45   : > { %s774_s29 = scalar_lea.hbm %s1111_s23, 128  ;;  %s779_s0 = scalar_lea.hbm %s1252_s1, 256 }
  0x46   : > { %s1271_s12 = scalar_select %p1104_p2, 1, 0 }
  0x47   : > { %p775_p10 = scmp.ne.s32.totalorder %s1111_s23, %s774_s29  ;;  %p780_p6 = scmp.lt.u32.totalorder %s1111_s23, %s1252_s1 }
  0x48   : > { %p781_p9 = scmp.lt.u32.totalorder %s779_s0, %s774_s29  ;;  %p783_p11 = scmp.lt.u32.totalorder %s774_s29, %s1111_s23 }
  0x49   : > { %p777_p0 = pnand %p775_p10, %p746_p7 }
  0x4a   : > { %p782_p3 = por %p781_p9, %p780_p6 }
  0x4b   : > { %p778_p1 = pneg %p777_p0 }
  0x4c   : > { %p784_p12 = por %p783_p11, %p782_p3 }
  0x4e   : > { %p785_p5 = pnand %p784_p12, %p778_p1 }
  0x50   : > { %788 = shalt.err (!%p785_p5)
}
  0x51   : > { %s789_s22 = scalar_lea.vmem %s177_s18, 128  ;;  %s935_s7 = smov [#allocation6]  }
  0x52   : > { %p790_p13 = scmp.ne.s32.totalorder %s177_s18, %s789_s22  ;;  %s794_s3 = sshll.u32 %s935_s7, 4  ;;  %s795_s3 = int_to_ptr.vmem [resolvable:$false] %s794_s3 }
  0x53   : > { %s796_s24 = scalar_lea.vmem %s795_s3, 256  ;;  %p797_p8 = scmp.lt.s32.totalorder %s177_s18, %s795_s3 }
  0x54   : > { %p792_p10 = pnand %p790_p13, %p746_p7  ;;  %p798_p2 = scmp.lt.s32.totalorder %s796_s24, %s789_s22 }
  0x56   : > { %p793_p0 = pneg %p792_p10  ;;  %p799_p6 = por %p798_p2, %p797_p8 }
  0x58   : > { %p800_p9 = pnand %p799_p6, %p793_p0 }
  0x5a   : > { %803 = shalt.err (!%p800_p9)
}
  0x5b   : > { %630 = dma.hbm_to_vmem [thread:$0]  (!%p1066_p4), %s1111_s23, 128, %s177_s18, %s165_s25  }
  0x5c   : > { %p1272_p1 = scmp.ne.s32.totalorder %s1271_s12, 0 }
  0x5d   : > { %s187_s29 = sand.u32 (!%p1272_p1), 1, %s906_s13   ;;  %p1273_p7 = scmp.ne.s32.totalorder (!%p1272_p1), %s1264_s28, 0 }
  0x5e   : > { %185 = sbr.rel (%p1272_p1) target bundleno = 330 (0x14a), region = 28  ;;  %s608_s20 = sshll.u32 (!%p1272_p1), %s187_s29, 5 }
  0x5f   : > { %s188_s26 = scalar_lea.sflag (!%p1272_p1), [#allocation4], %s187_s29  ;;  %s191_s0 = scalar_lea.vmem (!%p1272_p1), [#allocation3], %s608_s20 }
  0x65   : > { %877 = dma.done.wait (%p1273_p7), %s188_s26, 512  }
  0x66   : > { %879 = vsyncadd (%p1273_p7), %s188_s26, 4294966784  ;;  %s609_s21 = sshll.u32 %s187_s29, 3  ;;  %s197_s8 = scalar_lea.sflag [#allocation7], %s187_s29 }
  0x67   : > { %s200_s30 = scalar_lea.vmem [#allocation6], %s609_s21 }
  0x68   : > { %881 = dma.done.wait (%p1273_p7), %s197_s8, 128  }
  0x69   : > { %883 = vsyncadd (%p1273_p7), %s197_s8, 4294967168  ;;  %v240_v0 = vlaneseq  ;;  %s611_s18 = sshll.u32 %s918_s16, 3  ;;  %v936_v1 = vmov 0.0   ;;  %v234_v6 = vld [vmem:[%s191_s0] sm:$0xff]  ;;  %v235_v7 = vld [vmem:[%s191_s0 + $0x8] sm:$0xff]  ;;  %vm327_vm1 = vcmask 1041409  }
  0x6a   : > { %230 = vst [vmem:[#allocation2] sm:$0xf] %v936_v1  ;;  %231 = vst [vmem:[#allocation2 + $0x4] sm:$0xf] %v936_v1  ;;  %v245_v3 = vstv %s611_s18  ;;  %v236_v8 = vld [vmem:[%s191_s0 + $0x10] sm:$0xff]  ;;  %v237_v9 = vld [vmem:[%s191_s0 + $0x18] sm:$0xff] }
  0x6b   : > { %232 = vst [vmem:[#allocation2 + $0x8] sm:$0xf] %v936_v1  ;;  %233 = vst [vmem:[#allocation2 + $0xc] sm:$0xf] %v936_v1  ;;  %v241_v2 = vshrl.u32 %v240_v0, 7  ;;  %v447_v4 = vand.u32 127, %v240_v0 }
  0x6c   : > { %v238_v10 = vld [vmem:[%s200_s30] sm:$0xff]  ;;  %vm329_vm2 = vcmask 1042434   ;;  %vm331_vm3 = vcmask 1043459   ;;  %vm429_vm4 = vcmask 1043456   ;;  %s223_s23 = sand.u32 1, %s894_s10   ;;  %s613_s12 = sshll.u32 %s918_s16, 1 }
  0x6d   : > { %v1145_v5 = vsub.s32 %v447_v4, %v241_v2  ;;  %vm246_vm0 = vcmp.ge.s32.totalorder %v241_v2, %v245_v3  ;;  %s610_s28 = sshll.u32 %s223_s23, 2  ;;  %s482_s25 = sadd.s32 %s914_s15, %s613_s12  ;;  %vm468_vm5 = vcmask 27648  }
  0x6e   : > { %v250_v11 = vsel %vm246_vm0, %v234_v6, 0.0  ;;  %v251_v12 = vsel %vm246_vm0, %v235_v7, 0.0  ;;  %v252_v13 = vsel %vm246_vm0, %v236_v8, 0.0  ;;  %v1147_v14 = vsel %vm246_vm0, %v238_v10, 0.0  ;;  %s614_s22 = sshll.u32 %s482_s25, 6  ;;  %s225_s7 = scalar_lea.vmem [#allocation8], %s610_s28 }
  0x6f   : > { %v253_v15 = vsel %vm246_vm0, %v237_v9, 0.0  ;;  %728 = vlog2.f32 %v250_v11  ;;  %v266_v16 = vsub.f32 1.0, %v250_v11  ;;  %v267_v17 = vsub.f32 1.0, %v251_v12  ;;  %s486_s3 = sshll.u32 %s225_s7, 4  ;;  %s1188_s24 = scalar_lea.hbm %s1253_s2, %s614_s22  ;;  %s1190_s3 = int_to_ptr.vmem [resolvable:$true] %s486_s3 }
  0x70   : > { %730 = vlog2.f32 %v251_v12  ;;  %v268_v18 = vsub.f32 1.0, %v252_v13  ;;  %v269_v19 = vsub.f32 1.0, %v253_v15  ;;  %v378_v20 = vrot.slane %v250_v11, 4  ;;  %s471_s29 = scalar_lea.sflag [#allocation5], %s223_s23  ;;  %s804_s20 = scalar_lea.vmem %s1190_s3, 64 }
  0x71   : > { %732 = vlog2.f32 %v252_v13  ;;  %v384_v21 = vrot.slane %v251_v12, 4  ;;  %v390_v22 = vrot.slane %v252_v13, 4  ;;  %v396_v23 = vrot.slane %v253_v15, 4  ;;  %p805_p8 = scmp.ne.s32.totalorder %s1190_s3, %s804_s20  ;;  %p1274_p4 = scmp.ne.s32.totalorder %s1265_s5, 0 }
  0x72   : > { %734 = vlog2.f32 %v253_v15  ;;  %v338_v24 = vmul.f32 %v250_v11, %v1147_v14  ;;  %v339_v25 = vmul.f32 %v251_v12, %v1147_v14  ;;  %v379_v26 = vadd.f32 %v378_v20, %v250_v11  ;;  %v377_v6 = vld [vmem:[#allocation2 + $0x8] sm:$0xf]  ;;  %s937_s26 = smov [#allocation8]  }
  0x73   : > { %736 = vlog2.f32 %v266_v16  ;;  %v385_v27 = vadd.f32 %v384_v21, %v251_v12  ;;  %v391_v28 = vadd.f32 %v390_v22, %v252_v13  ;;  %v397_v29 = vadd.f32 %v396_v23, %v253_v15  ;;  %p806_p2 = pnand %p805_p8, %p1274_p4  ;;  %s808_s0 = sshll.u32 %s937_s26, 4  ;;  %s809_s0 = int_to_ptr.vmem [resolvable:$false] %s808_s0 }
  0x74   : > { %738 = vlog2.f32 %v267_v17  ;;  %v340_v30 = vmul.f32 %v252_v13, %v1147_v14  ;;  %v1153_v31 = vmul.f32 %v253_v15, %v1147_v14  ;;  %v380_v32 = vrot.slane %v379_v26, 2  ;;  %s810_s21 = scalar_lea.vmem %s809_s0, 128  ;;  %p811_p11 = scmp.lt.s32.totalorder %s1190_s3, %s809_s0 }
  0x75   : > { %740 = vlog2.f32 %v268_v18  ;;  %v386_v33 = vrot.slane %v385_v27, 2  ;;  %v392_v34 = vrot.slane %v391_v28, 2  ;;  %v398_v35 = vrot.slane %v397_v29, 2  ;;  %p807_p3 = pneg %p806_p2  ;;  %p812_p12 = scmp.lt.s32.totalorder %s810_s21, %s804_s20 }
  0x76   : > { %742 = vlog2.f32 %v269_v19  ;;  %v342_v36 = vrot.slane %v338_v24, 4  ;;  %v348_v37 = vrot.slane %v339_v25, 4  ;;  %v381_v38 = vadd.f32 %v380_v32, %v379_v26 }
  0x77   : > { %v387_v39 = vadd.f32 %v386_v33, %v385_v27  ;;  %v393_v40 = vadd.f32 %v392_v34, %v391_v28  ;;  %v354_v41 = vrot.slane %v340_v30, 4  ;;  %v399_v42 = vadd.f32 %v398_v35, %v397_v29  ;;  %p813_p5 = por %p812_p12, %p811_p11 }
  0x78   : > { %v343_v43 = vadd.f32 %v342_v36, %v338_v24  ;;  %v349_v44 = vadd.f32 %v348_v37, %v339_v25  ;;  %v360_v45 = vrot.slane %v1153_v31, 4  ;;  %v382_v47 = vrot.slane %v381_v38, 1 }
  0x79   : > { %v729_v46 = vpop.eup %728  ;;  %v388_v48 = vrot.slane %v387_v39, 1  ;;  %v394_v49 = vrot.slane %v393_v40, 1  ;;  %v355_v50 = vadd.f32 %v354_v41, %v340_v30  ;;  %v400_v53 = vrot.slane %v399_v42, 1  ;;  %p814_p13 = pnand %p813_p5, %p807_p3 }
  0x7a   : > { %v731_v51 = vpop.eup %730  ;;  %v255_v52 = vmul.f32 0.6931472, %v729_v46  ;;  %v344_v54 = vrot.slane %v343_v43, 2  ;;  %v350_v55 = vrot.slane %v349_v44, 2  ;;  %v383_v58 = vadd.f32 %v382_v47, %v381_v38 }
  0x7b   : > { %v733_v56 = vpop.eup %732  ;;  %v257_v57 = vmul.f32 0.6931472, %v731_v51  ;;  %v389_v59 = vadd.f32 %v388_v48, %v387_v39  ;;  %v395_v60 = vadd.f32 %v394_v49, %v393_v40  ;;  %v401_v0 = vadd.f32 %v400_v53, %v399_v42 }
  0x7c   : > { %v735_v61 = vpop.eup %734  ;;  %v259_v62 = vmul.f32 0.6931472, %v733_v56  ;;  %v262_v63 = vmax.f32 %v255_v52, -100.0  ;;  %v345_v1 = vadd.f32 %v344_v54, %v343_v43  ;;  %v351_v8 = vadd.f32 %v350_v55, %v349_v44 }
  0x7d   : > { %v737_v2 = vpop.eup %736  ;;  %v261_v3 = vmul.f32 0.6931472, %v735_v61  ;;  %v263_v4 = vmax.f32 %v257_v57, -100.0  ;;  %v406_v7 = vsel %vm327_vm1, %v389_v59, %v383_v58  ;;  %v356_v28 = vrot.slane %v355_v50, 2 }
  0x7e   : > { %v739_v9 = vpop.eup %738  ;;  %v264_v10 = vmax.f32 %v259_v62, -100.0  ;;  %v271_v11 = vmul.f32 0.6931472, %v737_v2  ;;  %v407_v12 = vsel %vm329_vm2, %v395_v60, %v406_v7  ;;  %v346_v13 = vrot.slane %v345_v1, 1  ;;  %v337_v62 = vld [vmem:[#allocation2 + $0x4] sm:$0xf] }
  0x7f   : > { %v741_v15 = vpop.eup %740  ;;  %v265_v16 = vmax.f32 %v261_v3, -100.0  ;;  %v273_v17 = vmul.f32 0.6931472, %v739_v9  ;;  %v408_v18 = vsel %vm331_vm3, %v401_v0, %v407_v12  ;;  %v352_v19 = vrot.slane %v351_v8, 1 }
  0x80   : > { %v743_v20 = vpop.eup %742  ;;  %v275_v21 = vmul.f32 0.6931472, %v741_v15  ;;  %v278_v22 = vmax.f32 %v271_v11, -100.0  ;;  %v410_v23 = vadd.f32 %v408_v18, %v377_v6  ;;  %v347_v24 = vadd.f32 %v346_v13, %v345_v1  ;;  %v413_v6 = vld [vmem:[#allocation2 + $0xc] sm:$0xf] }
  0x81   : > { %v277_v25 = vmul.f32 0.6931472, %v743_v20  ;;  %v279_v26 = vmax.f32 %v273_v17, -100.0  ;;  %v353_v27 = vadd.f32 %v352_v19, %v351_v8  ;;  %v361_v32 = vadd.f32 %v360_v45, %v1153_v31 }
  0x82   : > { %v280_v29 = vmax.f32 %v275_v21, -100.0  ;;  %v282_v30 = vsub.f32 %v262_v63, %v278_v22  ;;  %411 = vst [vmem:[#allocation2 + $0x8] sm:$0xf] %v410_v23  ;;  %v414_v33 = vrot.slane %v1147_v14, 4  ;;  %v357_v36 = vadd.f32 %v356_v28, %v355_v50 }
  0x83   : > { %v281_v34 = vmax.f32 %v277_v25, -100.0  ;;  %v283_v35 = vsub.f32 %v263_v4, %v279_v26  ;;  %v362_v39 = vrot.slane %v361_v32, 2  ;;  %v370_v44 = vsel %vm327_vm1, %v353_v27, %v347_v24 }
  0x84   : > { %v284_v37 = vsub.f32 %v264_v10, %v280_v29  ;;  %v286_v38 = vmul.f32 %v282_v30, %v1147_v14  ;;  %v415_v40 = vadd.f32 %v414_v33, %v1147_v14  ;;  %v358_v43 = vrot.slane %v357_v36, 1  ;;  %v298_v30 = vld [vmem:[#allocation2] sm:$0xf] }
  0x85   : > { %v285_v41 = vsub.f32 %v265_v16, %v281_v34  ;;  %v287_v42 = vmul.f32 %v283_v35, %v1147_v14  ;;  %v363_v45 = vadd.f32 %v362_v39, %v361_v32 }
  0x86   : > { %v288_v46 = vmul.f32 %v284_v37, %v1147_v14  ;;  %v290_v31 = vadd.f32 %v286_v38, %v278_v22  ;;  %v416_v47 = vrot.slane %v415_v40, 2  ;;  %v359_v50 = vadd.f32 %v358_v43, %v357_v36 }
  0x87   : > { %v289_v48 = vmul.f32 %v285_v41, %v1147_v14  ;;  %v291_v49 = vadd.f32 %v287_v42, %v279_v26  ;;  %v364_v53 = vrot.slane %v363_v45, 1 }
  0x88   : > { %v292_v51 = vadd.f32 %v288_v46, %v280_v29  ;;  %v294_v52 = vsub.f32 0.0, %v290_v31  ;;  %v417_v54 = vadd.f32 %v416_v47, %v415_v40  ;;  %v371_v58 = vsel %vm329_vm2, %v359_v50, %v370_v44 }
  0x89   : > { %v293_v55 = vadd.f32 %v289_v48, %v281_v34  ;;  %v295_v56 = vsub.f32 0.0, %v291_v49  ;;  %v427_v57 = vld [vmem:[#allocation2 + $0x8] sm:$0xf]  ;;  %v365_v63 = vadd.f32 %v364_v53, %v363_v45 }
  0x8a   : > { %v296_v59 = vsub.f32 0.0, %v292_v51  ;;  %v299_v60 = vrot.slane %v294_v52, 4  ;;  %v436_v61 = vsel %vm429_vm4, %v427_v57, 0.0  ;;  %v418_v1 = vrot.slane %v417_v54, 1 }
  0x8b   : > { %v297_v0 = vsub.f32 0.0, %v293_v55  ;;  %v305_v14 = vrot.slane %v295_v56, 4  ;;  %437 = vadd.xlane.f32.xlu1 %v436_v61  ;;  %v372_v4 = vsel %vm331_vm3, %v365_v63, %v371_v58 }
  0x8c   : > { %v300_v2 = vadd.f32 %v299_v60, %v294_v52  ;;  %v311_v3 = vrot.slane %v296_v59, 4  ;;  %v374_v9 = vadd.f32 %v372_v4, %v337_v62  ;;  %v419_v10 = vadd.f32 %v418_v1, %v417_v54 }
  0x8d   : > { %v306_v7 = vadd.f32 %v305_v14, %v295_v56  ;;  %v317_v8 = vrot.slane %v297_v0, 4 }
  0x8e   : > { %v301_v11 = vrot.slane %v300_v2, 2  ;;  %v312_v12 = vadd.f32 %v311_v3, %v296_v59  ;;  %375 = vst [vmem:[#allocation2 + $0x4] sm:$0xf] %v374_v9  ;;  %v420_v16 = vadd.f32 %v419_v10, %v413_v6 }
  0x8f   : > { %v307_v13 = vrot.slane %v306_v7, 2  ;;  %v318_v15 = vadd.f32 %v317_v8, %v297_v0 }
  0x90   : > { %v302_v17 = vadd.f32 %v301_v11, %v300_v2  ;;  %v313_v18 = vrot.slane %v312_v12, 2  ;;  %421 = vst [vmem:[#allocation2 + $0xc] sm:$0xf] %v420_v16 }
  0x91   : > { %v308_v19 = vadd.f32 %v307_v13, %v306_v7  ;;  %v319_v20 = vrot.slane %v318_v15, 2 }
  0x92   : > { %v303_v21 = vrot.slane %v302_v17, 1  ;;  %v314_v22 = vadd.f32 %v313_v18, %v312_v12 }
  0x93   : > { %v309_v23 = vrot.slane %v308_v19, 1  ;;  %v320_v24 = vadd.f32 %v319_v20, %v318_v15 }
  0x94   : > { %v304_v25 = vadd.f32 %v303_v21, %v302_v17  ;;  %v315_v26 = vrot.slane %v314_v22, 1 }
  0x95   : > { %v310_v27 = vadd.f32 %v309_v23, %v308_v19  ;;  %v321_v28 = vrot.slane %v320_v24, 1  ;;  %v426_v40 = vld [vmem:[#allocation2 + $0x4] sm:$0xf] }
  0x96   : > { %v316_v29 = vadd.f32 %v315_v26, %v314_v22  ;;  %v433_v42 = vsel %vm429_vm4, %v426_v40, 0.0 }
  0x97   : > { %v322_v32 = vadd.f32 %v321_v28, %v320_v24  ;;  %v328_v33 = vsel %vm327_vm1, %v310_v27, %v304_v25  ;;  %v428_v35 = vld [vmem:[#allocation2 + $0xc] sm:$0xf] }
  0x98   : > { %v330_v34 = vsel %vm329_vm2, %v316_v29, %v328_v33  ;;  %v439_v37 = vsel %vm429_vm4, %v428_v35, 0.0 }
  0x99   : > { %v332_v36 = vsel %vm331_vm3, %v322_v32, %v330_v34  ;;  %440 = vadd.xlane.f32.xlu1 %v439_v37 }
  0x9a   : > { %v334_v38 = vadd.f32 %v332_v36, %v298_v30 }
  0x9c   : > { %335 = vst [vmem:[#allocation2] sm:$0xf] %v334_v38 }
  0xa3   : > { %v425_v39 = vld [vmem:[#allocation2] sm:$0xf] }
  0xa4   : > { %v430_v41 = vsel %vm429_vm4, %v425_v39, 0.0 }
  0xa5   : > { %431 = vadd.xlane.f32.xlu0 %v430_v41 }
  0xa9   : > { %434 = vadd.xlane.f32.xlu0 %v433_v42 }
 0x118   : > { %v438_v43 = vpop.xlane.xlu1 %437 }
 0x119   : > { %v459_v49 = vrot.slane %v438_v43, %v1145_v5 }
 0x126   : > { %v441_v46 = vpop.xlane.xlu1 %440 }
 0x127   : > { %v463_v48 = vrot.slane %v441_v46, %v1145_v5 }
 0x132   : > { %v432_v44 = vpop.xlane.xlu0 %431 }
 0x133   : > { %v451_v45 = vrot.slane %v432_v44, %v1145_v5 }
 0x136   : > { %v435_v31 = vpop.xlane.xlu0 %434 }
 0x137   : > { %v455_v47 = vrot.slane %v435_v31, %v1145_v5 }
 0x139   : > { %v464_v50 = vsel %vm327_vm1, %v455_v47, %v451_v45 }
 0x13a   : > { %v465_v51 = vsel %vm329_vm2, %v459_v49, %v464_v50 }
 0x13b   : > { %v466_v52 = vsel %vm331_vm3, %v463_v48, %v465_v51 }
 0x13c   : > { %469 = vst.msk [vmem:[%s225_s7] sm:$0xf] %vm468_vm5, %v466_v52 }
 0x13d   : > { %817 = shalt.err (!%p814_p13)
}
 0x13e   : > { %s818_s8 = scalar_lea.hbm %s1188_s24, 64  ;;  %s822_s23 = scalar_lea.hbm %s1253_s2, 256 }
 0x13f   : > { %p819_p10 = scmp.ne.s32.totalorder %s1188_s24, %s818_s8  ;;  %p823_p9 = scmp.lt.u32.totalorder %s1188_s24, %s1253_s2 }
 0x140   : > { %p824_p1 = scmp.lt.u32.totalorder %s822_s23, %s818_s8  ;;  %p826_p8 = scmp.lt.u32.totalorder %s818_s8, %s1188_s24 }
 0x141   : > { %p820_p0 = pnand %p819_p10, %p1274_p4 }
 0x142   : > { %p825_p7 = por %p824_p1, %p823_p9 }
 0x143   : > { %p821_p6 = pneg %p820_p0 }
 0x144   : > { %p827_p2 = por %p826_p8, %p825_p7 }
 0x146   : > { %p828_p3 = pnand %p827_p2, %p821_p6 }
 0x148   : > { %831 = shalt.err (!%p828_p3)
}
 0x149   : > { %622 = dma.vmem_to_hbm [thread:$0]  (%p1274_p4), %s1190_s3, 64, %s1188_s24, %s471_s29  }
 0x14a PF: > { %p636_p11 = scmp.ge.s32.totalorder %s930_s19, 2  ;;  %s498_s25 = sand.u32 1, %s890_s9  }
 0x14b   : > { %p1275_p12 = scmp.ne.s32.totalorder %s1266_s6, 0  ;;  %s499_s22 = scalar_lea.sflag [#allocation5], %s498_s25 }
 0x14d   : > { %p632_p5 = pnand %p636_p11, %p1275_p12 }
 0x14f   : > { %885 = dma.done.wait (!%p632_p5), %s499_s22, 64  }
 0x150   : > { %887 = vsyncadd (!%p632_p5), %s499_s22, 4294967232  ;;  %s21_s19 = sadd.s32 1, %s930_s19   ;;  %s1276_s16 = sld [smem:[#allocation12_spill]] }
 0x151   : > { %p18_p13 = scmp.ge.s32.totalorder %s21_s19, 6   ;;  %s1277_s5 = sld [smem:[#allocation13_spill]] }
 0x152   : > { %s1278_s18 = sld [smem:[#allocation14_spill]]  ;;  %s1279_s9 = smov %s894_s10 }
 0x153   : > { %s1280_s10 = smov %s898_s11  ;;  %s1281_s11 = smov %s1041_s4 }
 0x154   : > { %s1282_s12 = smov %s906_s13  ;;  %s1283_s13 = smov %s910_s14 }
 0x155   : > { %s1284_s14 = smov %s1027_s27  ;;  %s1285_s15 = smov %s922_s17 }
 0x156   :  { %20 = sbr.rel (!%p18_p13) target bundleno = 13 (0xd), region = 97 }
 0x157   : > { %s1286_s17 = smov %s1277_s5 }
 0x15d   :  { %504 = vsyncpa [#allocation4], 1 }
 0x15e   :  { %506 = vsyncpa [#allocation4 + $0x1], 1 }
 0x15f   :  { %507 = vsyncpa [#allocation7], 1 }
 0x160   :  { %509 = vsyncpa [#allocation7 + $0x1], 1 }
 0x161   :  { %510 = vsyncpa [#allocation5], 1 }
 0x162   :  { %512 = vsyncpa [#allocation5 + $0x1], 1 }

</bundles_post_ra>
